<compile_context>
chip_gen: v5e
topology: v5e:2x2
jax: 0.10.0
libtpu: 0.0.40
codegen_flags: <defaults>
</compile_context>

<pallas_src>
import jax
import jax.numpy as jnp
from jax.experimental import pallas as pl
from jax.experimental.pallas import tpu as pltpu


def _round_up(x, m):
    return ((x + m - 1) // m) * m


def hessian_diag_kernel(l0_ref, l1_ref,
                        wmix1_ref, w1as_ref, w1av_ref, b1a_ref, w1b_ref, b1b_ref,
                        wmix2v_ref, w2as_ref, w2av_ref, b2a_ref, w2b_ref, b2b_ref,
                        out_ref):
    """One atom tile: two GatedEquivariantBlocks (scalar branch of block 2 only).

    l1_ref holds the tile's vector representation as a lane-dense (3*T, C) slab with
    rows ordered [direction, atom]:  row d*T + t  ==  l1[t, d, :].
    """
    T = l0_ref.shape[0]
    F1 = wmix2v_ref.shape[0]
    f32 = jnp.float32

    l0 = l0_ref[...]                                                     # (T, C)
    l1 = l1_ref[...]                                                     # (3T, C)

    # ---- Block 1 ------------------------------------------------------------
    # mix_vectors for all 3 Cartesian components in a single MXU pass.
    vmix1 = jnp.dot(l1, wmix1_ref[...], preferred_element_type=f32)      # (3T, 2F1)
    v1sq = jnp.square(vmix1[:, :F1])
    vn1 = jnp.sqrt(v1sq[0:T] + v1sq[T:2 * T] + v1sq[2 * T:3 * T])        # (T, F1)

    # scalar_net dense 1: Dense(concat([l0, |V1|])) written as a split-weight sum.
    h1 = (jnp.dot(l0, w1as_ref[...], preferred_element_type=f32)
          + jnp.dot(vn1, w1av_ref[...], preferred_element_type=f32)
          + b1a_ref[...])
    h1 = h1 * jax.lax.logistic(h1)                                       # SiLU
    y1 = jnp.dot(h1, w1b_ref[...], preferred_element_type=f32) + b1b_ref[...]  # (T, 2F1)
    s1 = y1[:, :F1]                                                      # scalar out
    x1 = y1[:, F1:]                                                      # vector gate (no act)
    s1 = s1 * jax.lax.logistic(s1)                                       # sactivation

    # block-1 vector output, kept stacked over directions: x1 gates the W half.
    w1part = vmix1[:, F1:]                                               # (3T, F1)
    vec1 = w1part * jnp.concatenate([x1, x1, x1], axis=0)                # (3T, F1)

    # ---- Block 2 (scalar branch only; its vector output is discarded) --------
    v2 = jnp.dot(vec1, wmix2v_ref[...], preferred_element_type=f32)      # (3T, 3)
    v2sq = jnp.square(v2)
    vn2 = jnp.sqrt(v2sq[0:T] + v2sq[T:2 * T] + v2sq[2 * T:3 * T])        # (T, 3)

    h2 = jnp.dot(s1, w2as_ref[...], preferred_element_type=f32) + b2a_ref[...]
    # K=3 contraction |V2| @ W done on the VPU (broadcast FMA), not the MXU.
    w2av = w2av_ref[...]                                                 # (3, H2)
    h2 = h2 + vn2[:, 0:1] * w2av[0:1, :]
    h2 = h2 + vn2[:, 1:2] * w2av[1:2, :]
    h2 = h2 + vn2[:, 2:3] * w2av[2:3, :]
    h2 = h2 * jax.lax.logistic(h2)                                       # SiLU

    out = jnp.dot(h2, w2b_ref[...], preferred_element_type=f32) + b2b_ref[...]  # (T, 3)
    out_ref[...] = out.astype(out_ref.dtype)


def hessian_diagonal_l0_forward(l0, l1, params, *, tile_atoms=128):
    """Returns inputs['diagonal'] = outnet((l0, l1))[0].flatten(), shape (3*N,)."""
    N, C = l0.shape
    assert l1.shape == (N, 3, C)

    F1 = params["wmix2"].shape[0]
    H1 = params["w1a"].shape[1]
    H2 = params["w2a"].shape[1]

    T = min(tile_atoms, _round_up(N, 8))
    N_pad = _round_up(N, T)
    G = N_pad // T

    l0_p = jnp.pad(l0, ((0, N_pad - N), (0, 0)))
    l1_p = jnp.pad(l1, ((0, N_pad - N), (0, 0), (0, 0)))
    # Layout plumbing: each grid block is a lane-dense (3*T, C) slab with rows ordered
    # [direction, atom-within-tile] so the kernel uses cheap static sublane slices and
    # a single fused matmul instead of a 3-D reshape and three small matmuls.
    l1_r = (l1_p.reshape(G, T, 3, C)
            .transpose(0, 2, 1, 3)
            .reshape(G * 3 * T, C))

    f32 = jnp.float32
    wmix1 = params["wmix1"].astype(f32)                   # (C, 2*F1)
    w1a_s = params["w1a"][:C].astype(f32)                 # (C, H1)   split of concat-weight
    w1a_v = params["w1a"][C:].astype(f32)                 # (F1, H1)
    b1a = params["b1a"].reshape(1, H1).astype(f32)
    w1b = params["w1b"].astype(f32)                       # (H1, 2*F1)
    b1b = params["b1b"].reshape(1, 2 * F1).astype(f32)
    wmix2_v = params["wmix2"][:, :3].astype(f32)          # (F1, 3)   W-half never needed
    w2a_s = params["w2a"][:F1].astype(f32)                # (F1, H2)
    w2a_v = params["w2a"][F1:].astype(f32)                # (3, H2)
    b2a = params["b2a"].reshape(1, H2).astype(f32)
    w2b_s = params["w2b"][:, :3].astype(f32)              # (H2, 3)   vector gate never needed
    b2b_s = params["b2b"][:3].reshape(1, 3).astype(f32)

    weights = [wmix1, w1a_s, w1a_v, b1a, w1b, b1b,
               wmix2_v, w2a_s, w2a_v, b2a, w2b_s, b2b_s]

    in_specs = [
        pl.BlockSpec((T, C), lambda i: (i, 0)),           # l0 atom tile
        pl.BlockSpec((3 * T, C), lambda i: (i, 0)),       # l1 tile (3 directions stacked)
    ] + [pl.BlockSpec(w.shape, lambda i: (0, 0)) for w in weights]
    out_spec = pl.BlockSpec((T, 3), lambda i: (i, 0))

    flops_per_atom = 2 * (3 * C * 2 * F1              # block-1 mix_vectors
                          + C * H1 + F1 * H1          # block-1 scalar dense 1 (split)
                          + H1 * 2 * F1               # block-1 scalar dense 2
                          + 3 * F1 * 3                # block-2 mix_vectors (V half)
                          + F1 * H2 + 3 * H2          # block-2 scalar dense 1
                          + H2 * 3)                   # block-2 scalar dense 2 (scalar half)
    transc_per_atom = H1 + 2 * F1 + H2 + 3            # sigmoids + sqrts
    bytes_accessed = int(l0_p.size * l0_p.dtype.itemsize
                         + l1_r.size * l1_r.dtype.itemsize
                         + N_pad * 3 * 4
                         + sum(int(w.size) * 4 for w in weights))

    out = pl.pallas_call(
        hessian_diag_kernel,
        out_shape=jax.ShapeDtypeStruct((N_pad, 3), jnp.float32),
        grid=(G,),
        in_specs=in_specs,
        out_specs=out_spec,
        compiler_params=pltpu.CompilerParams(
            dimension_semantics=("parallel",),
            vmem_limit_bytes=32 * 1024 * 1024,
        ),
        cost_estimate=pl.CostEstimate(
            flops=int(N_pad * flops_per_atom),
            transcendentals=int(N_pad * transc_per_atom),
            bytes_accessed=bytes_accessed,
        ),
    )(l0_p, l1_r, *weights)

    return out[:N].reshape(-1)                         # inputs['diagonal'] = l0_out.flatten()


# ----------------------------- pure-JAX reference ---------------------------------
def init_params(key, n_in):
    """Params for build_gated_equivariant_mlp(n_in, n_out=3, n_layers=2, n_hidden=None).

    Weights use (fan_in, fan_out) convention (transpose of torch.nn.Linear.weight).
    """
    F1 = max(3, n_in // 2)
    H1, H2 = n_in, F1
    ks = jax.random.split(key, 10)

    def w(k, fi, fo):
        return jax.random.normal(k, (fi, fo), jnp.float32) / jnp.sqrt(fi)

    def b(k, fo):
        return 0.01 * jax.random.normal(k, (fo,), jnp.float32)

    return {
        # block 1: n_sin=n_vin=n_in, n_sout=n_vout=F1, n_hidden=n_in, sactivation=silu
        "wmix1": w(ks[0], n_in, 2 * F1),                       # mix_vectors (bias-free)
        "w1a": w(ks[1], n_in + F1, H1), "b1a": b(ks[2], H1),   # scalar_net dense 1
        "w1b": w(ks[3], H1, 2 * F1), "b1b": b(ks[4], 2 * F1),  # scalar_net dense 2
        # block 2: n_sin=n_vin=F1, n_sout=n_vout=3, n_hidden=F1, sactivation=None
        "wmix2": w(ks[5], F1, 2 * 3),
        "w2a": w(ks[6], F1 + 3, H2), "b2a": b(ks[7], H2),
        "w2b": w(ks[8], H2, 2 * 3), "b2b": b(ks[9], 2 * 3),
    }


def _gated_block_ref(s, v, wmix, wa, ba, wb, bb, n_sout, n_vout, sact):
    vmix = jnp.einsum("ndc,cf->ndf", v, wmix)
    V, W = vmix[..., :n_vout], vmix[..., n_vout:]
    Vn = jnp.sqrt(jnp.sum(V * V, axis=-2))
    ctx = jnp.concatenate([s, Vn], axis=-1)
    h = jax.nn.silu(ctx @ wa + ba)
    y = h @ wb + bb
    s_out, x = y[..., :n_sout], y[..., n_sout:]
    v_out = x[:, None, :] * W
    if sact:
        s_out = jax.nn.silu(s_out)
    return s_out, v_out


def hessian_diagonal_l0_ref(l0, l1, params):
    F1 = params["wmix2"].shape[0]
    s, v = _gated_block_ref(l0, l1, params["wmix1"], params["w1a"], params["b1a"],
                            params["w1b"], params["b1b"], F1, F1, True)
    s, _ = _gated_block_ref(s, v, params["wmix2"], params["w2a"], params["b2a"],
                            params["w2b"], params["b2b"], 3, 3, False)
    return s.reshape(-1)


if __name__ == "__main__":
    N, n_in = 16, 32          # small system: 16 atoms, 32-wide PaiNN representation
    key = jax.random.PRNGKey(0)
    k_l0, k_l1, k_p = jax.random.split(key, 3)
    l0 = jax.random.normal(k_l0, (N, n_in), dtype=jnp.float32)       # scalar_representation
    l1 = jax.random.normal(k_l1, (N, 3, n_in), dtype=jnp.float32)    # vector_representation
    params = init_params(k_p, n_in)

    diag = hessian_diagonal_l0_forward(l0, l1, params)
    diag = jax.block_until_ready(diag)

    diag_ref = hessian_diagonal_l0_ref(l0, l1, params)

    assert diag.shape == (3 * N,)
    assert jnp.allclose(diag, diag_ref, atol=1e-4, rtol=1e-4), (
        float(jnp.max(jnp.abs(diag - diag_ref))))
    # TODO(synk): the PyTorch module mutates/returns the `inputs` dict and supports
    # arbitrary n_layers / n_hidden; only the default two-block configuration
    # (n_layers=2, n_hidden=None) is implemented here.
    print("KERNEL_OK")
</pallas_src>

<mosaic_0001>
module attributes {stable_mosaic.version = 11 : i64} {
  func.func @hessian_diag_kernel(%arg0: i32, %arg1: memref<16x32xf32, #tpu.memory_space<vmem>>, %arg2: memref<48x32xf32, #tpu.memory_space<vmem>>, %arg3: memref<32x32xf32, #tpu.memory_space<vmem>>, %arg4: memref<32x32xf32, #tpu.memory_space<vmem>>, %arg5: memref<16x32xf32, #tpu.memory_space<vmem>>, %arg6: memref<1x32xf32, #tpu.memory_space<vmem>>, %arg7: memref<32x32xf32, #tpu.memory_space<vmem>>, %arg8: memref<1x32xf32, #tpu.memory_space<vmem>>, %arg9: memref<16x3xf32, #tpu.memory_space<vmem>>, %arg10: memref<16x16xf32, #tpu.memory_space<vmem>>, %arg11: memref<3x16xf32, #tpu.memory_space<vmem>>, %arg12: memref<1x16xf32, #tpu.memory_space<vmem>>, %arg13: memref<16x3xf32, #tpu.memory_space<vmem>>, %arg14: memref<1x3xf32, #tpu.memory_space<vmem>>, %arg15: memref<16x3xf32, #tpu.memory_space<vmem>>) attributes {dimension_semantics = [#tpu.dimension_semantics<parallel>], iteration_bounds = array<i64: 1>, scalar_prefetch = 0 : i64, scratch_operands = 0 : i64, tpu.core_type = #tpu.core_type<tc>, window_params = [{transform_indices = @transform_0, window_bounds = array<i64: 16, 32>}, {transform_indices = @transform_1, window_bounds = array<i64: 48, 32>}, {pipeline_mode = #tpu.pipeline_mode<synchronous>, transform_indices = @transform_2, window_bounds = array<i64: 32, 32>}, {pipeline_mode = #tpu.pipeline_mode<synchronous>, transform_indices = @transform_3, window_bounds = array<i64: 32, 32>}, {pipeline_mode = #tpu.pipeline_mode<synchronous>, transform_indices = @transform_4, window_bounds = array<i64: 16, 32>}, {pipeline_mode = #tpu.pipeline_mode<synchronous>, transform_indices = @transform_5, window_bounds = array<i64: 1, 32>}, {pipeline_mode = #tpu.pipeline_mode<synchronous>, transform_indices = @transform_6, window_bounds = array<i64: 32, 32>}, {pipeline_mode = #tpu.pipeline_mode<synchronous>, transform_indices = @transform_7, window_bounds = array<i64: 1, 32>}, {pipeline_mode = #tpu.pipeline_mode<synchronous>, transform_indices = @transform_8, window_bounds = array<i64: 16, 3>}, {pipeline_mode = #tpu.pipeline_mode<synchronous>, transform_indices = @transform_9, window_bounds = array<i64: 16, 16>}, {pipeline_mode = #tpu.pipeline_mode<synchronous>, transform_indices = @transform_10, window_bounds = array<i64: 3, 16>}, {pipeline_mode = #tpu.pipeline_mode<synchronous>, transform_indices = @transform_11, window_bounds = array<i64: 1, 16>}, {pipeline_mode = #tpu.pipeline_mode<synchronous>, transform_indices = @transform_12, window_bounds = array<i64: 16, 3>}, {pipeline_mode = #tpu.pipeline_mode<synchronous>, transform_indices = @transform_13, window_bounds = array<i64: 1, 3>}, {transform_indices = @transform_14, window_bounds = array<i64: 16, 3>}]} {
    %c0 = arith.constant 0 : index
    %c0_0 = arith.constant 0 : index
    %0 = vector.load %arg1[%c0, %c0_0] : memref<16x32xf32, #tpu.memory_space<vmem>>, vector<16x32xf32>
    %c0_1 = arith.constant 0 : index
    %c0_2 = arith.constant 0 : index
    %1 = vector.load %arg2[%c0_1, %c0_2] : memref<48x32xf32, #tpu.memory_space<vmem>>, vector<48x32xf32>
    %c0_3 = arith.constant 0 : index
    %c0_4 = arith.constant 0 : index
    %2 = vector.load %arg3[%c0_3, %c0_4] : memref<32x32xf32, #tpu.memory_space<vmem>>, vector<32x32xf32>
    %cst = arith.constant dense<0.000000e+00> : vector<48x32xf32>
    %3 = tpu.matmul %1, %2, %cst {dimension_numbers = #tpu.dot_dimension_numbers<[1], [0], [0], [1], [0, 0, 1, 1], [], []>} : vector<48x32xf32>, vector<32x32xf32>, vector<48x32xf32> -> vector<48x32xf32>
    %4 = vector.extract_strided_slice %3 {offsets = [0, 0], sizes = [48, 16], strides = [1, 1]} : vector<48x32xf32> to vector<48x16xf32>
    %5 = arith.mulf %4, %4 : vector<48x16xf32>
    %6 = vector.extract_strided_slice %5 {offsets = [0, 0], sizes = [16, 16], strides = [1, 1]} : vector<48x16xf32> to vector<16x16xf32>
    %7 = vector.extract_strided_slice %5 {offsets = [16, 0], sizes = [16, 16], strides = [1, 1]} : vector<48x16xf32> to vector<16x16xf32>
    %8 = arith.addf %6, %7 : vector<16x16xf32>
    %9 = vector.extract_strided_slice %5 {offsets = [32, 0], sizes = [16, 16], strides = [1, 1]} : vector<48x16xf32> to vector<16x16xf32>
    %10 = arith.addf %8, %9 : vector<16x16xf32>
    %11 = math.sqrt %10 : vector<16x16xf32>
    %c0_5 = arith.constant 0 : index
    %c0_6 = arith.constant 0 : index
    %12 = vector.load %arg4[%c0_5, %c0_6] : memref<32x32xf32, #tpu.memory_space<vmem>>, vector<32x32xf32>
    %cst_7 = arith.constant dense<0.000000e+00> : vector<16x32xf32>
    %13 = tpu.matmul %0, %12, %cst_7 {dimension_numbers = #tpu.dot_dimension_numbers<[1], [0], [0], [1], [0, 0, 1, 1], [], []>} : vector<16x32xf32>, vector<32x32xf32>, vector<16x32xf32> -> vector<16x32xf32>
    %c0_8 = arith.constant 0 : index
    %c0_9 = arith.constant 0 : index
    %14 = vector.load %arg5[%c0_8, %c0_9] : memref<16x32xf32, #tpu.memory_space<vmem>>, vector<16x32xf32>
    %cst_10 = arith.constant dense<0.000000e+00> : vector<16x32xf32>
    %15 = tpu.matmul %11, %14, %cst_10 {dimension_numbers = #tpu.dot_dimension_numbers<[1], [0], [0], [1], [0, 0, 1, 1], [], []>} : vector<16x16xf32>, vector<16x32xf32>, vector<16x32xf32> -> vector<16x32xf32>
    %16 = arith.addf %13, %15 : vector<16x32xf32>
    %c0_11 = arith.constant 0 : index
    %c0_12 = arith.constant 0 : index
    %17 = vector.load %arg6[%c0_11, %c0_12] : memref<1x32xf32, #tpu.memory_space<vmem>>, vector<1x32xf32>
    %18 = vector.broadcast %17 : vector<1x32xf32> to vector<16x32xf32>
    %19 = arith.addf %16, %18 : vector<16x32xf32>
    %20 = arith.negf %19 : vector<16x32xf32>
    %21 = math.exp %20 : vector<16x32xf32>
    %cst_13 = arith.constant 1.000000e+00 : f32
    %22 = vector.broadcast %cst_13 : f32 to vector<16x32xf32>
    %23 = arith.addf %22, %21 : vector<16x32xf32>
    %24 = arith.divf %22, %23 : vector<16x32xf32>
    %25 = arith.mulf %19, %24 : vector<16x32xf32>
    %c0_14 = arith.constant 0 : index
    %c0_15 = arith.constant 0 : index
    %26 = vector.load %arg7[%c0_14, %c0_15] : memref<32x32xf32, #tpu.memory_space<vmem>>, vector<32x32xf32>
    %cst_16 = arith.constant dense<0.000000e+00> : vector<16x32xf32>
    %27 = tpu.matmul %25, %26, %cst_16 {dimension_numbers = #tpu.dot_dimension_numbers<[1], [0], [0], [1], [0, 0, 1, 1], [], []>} : vector<16x32xf32>, vector<32x32xf32>, vector<16x32xf32> -> vector<16x32xf32>
    %c0_17 = arith.constant 0 : index
    %c0_18 = arith.constant 0 : index
    %28 = vector.load %arg8[%c0_17, %c0_18] : memref<1x32xf32, #tpu.memory_space<vmem>>, vector<1x32xf32>
    %29 = vector.broadcast %28 : vector<1x32xf32> to vector<16x32xf32>
    %30 = arith.addf %27, %29 : vector<16x32xf32>
    %31 = vector.extract_strided_slice %30 {offsets = [0, 0], sizes = [16, 16], strides = [1, 1]} : vector<16x32xf32> to vector<16x16xf32>
    %32 = vector.extract_strided_slice %30 {offsets = [0, 16], sizes = [16, 16], strides = [1, 1]} : vector<16x32xf32> to vector<16x16xf32>
    %33 = arith.negf %31 : vector<16x16xf32>
    %34 = math.exp %33 : vector<16x16xf32>
    %cst_19 = arith.constant 1.000000e+00 : f32
    %35 = vector.broadcast %cst_19 : f32 to vector<16x16xf32>
    %36 = arith.addf %35, %34 : vector<16x16xf32>
    %37 = arith.divf %35, %36 : vector<16x16xf32>
    %38 = arith.mulf %31, %37 : vector<16x16xf32>
    %39 = vector.extract_strided_slice %3 {offsets = [0, 16], sizes = [48, 16], strides = [1, 1]} : vector<48x32xf32> to vector<48x16xf32>
    %40 = tpu.concatenate %32, %32, %32 in 0 : vector<16x16xf32>, vector<16x16xf32>, vector<16x16xf32> -> vector<48x16xf32>
    %41 = arith.mulf %39, %40 : vector<48x16xf32>
    %c0_20 = arith.constant 0 : index
    %c0_21 = arith.constant 0 : index
    %42 = vector.load %arg9[%c0_20, %c0_21] : memref<16x3xf32, #tpu.memory_space<vmem>>, vector<16x3xf32>
    %cst_22 = arith.constant dense<0.000000e+00> : vector<48x3xf32>
    %43 = tpu.matmul %41, %42, %cst_22 {dimension_numbers = #tpu.dot_dimension_numbers<[1], [0], [0], [1], [0, 0, 1, 1], [], []>} : vector<48x16xf32>, vector<16x3xf32>, vector<48x3xf32> -> vector<48x3xf32>
    %44 = arith.mulf %43, %43 : vector<48x3xf32>
    %45 = vector.extract_strided_slice %44 {offsets = [0, 0], sizes = [16, 3], strides = [1, 1]} : vector<48x3xf32> to vector<16x3xf32>
    %46 = vector.extract_strided_slice %44 {offsets = [16, 0], sizes = [16, 3], strides = [1, 1]} : vector<48x3xf32> to vector<16x3xf32>
    %47 = arith.addf %45, %46 : vector<16x3xf32>
    %48 = vector.extract_strided_slice %44 {offsets = [32, 0], sizes = [16, 3], strides = [1, 1]} : vector<48x3xf32> to vector<16x3xf32>
    %49 = arith.addf %47, %48 : vector<16x3xf32>
    %50 = math.sqrt %49 : vector<16x3xf32>
    %c0_23 = arith.constant 0 : index
    %c0_24 = arith.constant 0 : index
    %51 = vector.load %arg10[%c0_23, %c0_24] : memref<16x16xf32, #tpu.memory_space<vmem>>, vector<16x16xf32>
    %cst_25 = arith.constant dense<0.000000e+00> : vector<16x16xf32>
    %52 = tpu.matmul %38, %51, %cst_25 {dimension_numbers = #tpu.dot_dimension_numbers<[1], [0], [0], [1], [0, 0, 1, 1], [], []>} : vector<16x16xf32>, vector<16x16xf32>, vector<16x16xf32> -> vector<16x16xf32>
    %c0_26 = arith.constant 0 : index
    %c0_27 = arith.constant 0 : index
    %53 = vector.load %arg12[%c0_26, %c0_27] : memref<1x16xf32, #tpu.memory_space<vmem>>, vector<1x16xf32>
    %54 = vector.broadcast %53 : vector<1x16xf32> to vector<16x16xf32>
    %55 = arith.addf %52, %54 : vector<16x16xf32>
    %c0_28 = arith.constant 0 : index
    %c0_29 = arith.constant 0 : index
    %56 = vector.load %arg11[%c0_28, %c0_29] : memref<3x16xf32, #tpu.memory_space<vmem>>, vector<3x16xf32>
    %57 = vector.extract_strided_slice %50 {offsets = [0, 0], sizes = [16, 1], strides = [1, 1]} : vector<16x3xf32> to vector<16x1xf32>
    %58 = vector.extract_strided_slice %56 {offsets = [0, 0], sizes = [1, 16], strides = [1, 1]} : vector<3x16xf32> to vector<1x16xf32>
    %59 = vector.broadcast %57 : vector<16x1xf32> to vector<16x16xf32>
    %60 = vector.broadcast %58 : vector<1x16xf32> to vector<16x16xf32>
    %61 = arith.mulf %59, %60 : vector<16x16xf32>
    %62 = arith.addf %55, %61 : vector<16x16xf32>
    %63 = vector.extract_strided_slice %50 {offsets = [0, 1], sizes = [16, 1], strides = [1, 1]} : vector<16x3xf32> to vector<16x1xf32>
    %64 = vector.extract_strided_slice %56 {offsets = [1, 0], sizes = [1, 16], strides = [1, 1]} : vector<3x16xf32> to vector<1x16xf32>
    %65 = vector.broadcast %63 : vector<16x1xf32> to vector<16x16xf32>
    %66 = vector.broadcast %64 : vector<1x16xf32> to vector<16x16xf32>
    %67 = arith.mulf %65, %66 : vector<16x16xf32>
    %68 = arith.addf %62, %67 : vector<16x16xf32>
    %69 = vector.extract_strided_slice %50 {offsets = [0, 2], sizes = [16, 1], strides = [1, 1]} : vector<16x3xf32> to vector<16x1xf32>
    %70 = vector.extract_strided_slice %56 {offsets = [2, 0], sizes = [1, 16], strides = [1, 1]} : vector<3x16xf32> to vector<1x16xf32>
    %71 = vector.broadcast %69 : vector<16x1xf32> to vector<16x16xf32>
    %72 = vector.broadcast %70 : vector<1x16xf32> to vector<16x16xf32>
    %73 = arith.mulf %71, %72 : vector<16x16xf32>
    %74 = arith.addf %68, %73 : vector<16x16xf32>
    %75 = arith.negf %74 : vector<16x16xf32>
    %76 = math.exp %75 : vector<16x16xf32>
    %cst_30 = arith.constant 1.000000e+00 : f32
    %77 = vector.broadcast %cst_30 : f32 to vector<16x16xf32>
    %78 = arith.addf %77, %76 : vector<16x16xf32>
    %79 = arith.divf %77, %78 : vector<16x16xf32>
    %80 = arith.mulf %74, %79 : vector<16x16xf32>
    %c0_31 = arith.constant 0 : index
    %c0_32 = arith.constant 0 : index
    %81 = vector.load %arg13[%c0_31, %c0_32] : memref<16x3xf32, #tpu.memory_space<vmem>>, vector<16x3xf32>
    %cst_33 = arith.constant dense<0.000000e+00> : vector<16x3xf32>
    %82 = tpu.matmul %80, %81, %cst_33 {dimension_numbers = #tpu.dot_dimension_numbers<[1], [0], [0], [1], [0, 0, 1, 1], [], []>} : vector<16x16xf32>, vector<16x3xf32>, vector<16x3xf32> -> vector<16x3xf32>
    %c0_34 = arith.constant 0 : index
    %c0_35 = arith.constant 0 : index
    %83 = vector.load %arg14[%c0_34, %c0_35] : memref<1x3xf32, #tpu.memory_space<vmem>>, vector<1x3xf32>
    %84 = vector.broadcast %83 : vector<1x3xf32> to vector<16x3xf32>
    %85 = arith.addf %82, %84 : vector<16x3xf32>
    %c0_36 = arith.constant 0 : index
    %c0_37 = arith.constant 0 : index
    %86 = vector.load %arg15[%c0_36, %c0_37] : memref<16x3xf32, #tpu.memory_space<vmem>>, vector<16x3xf32>
    tpu.vector_store %arg15[%c0_36, %c0_37], %85 {strides = array<i32>} : memref<16x3xf32, #tpu.memory_space<vmem>>, vector<16x3xf32>,
    return
  }
  func.func @transform_0(%arg0: i32) -> (i32, i32) {
    %c0_i32 = arith.constant 0 : i32
    %c0_i32_0 = arith.constant 0 : i32
    return %arg0, %c0_i32 : i32, i32
  }
  func.func @transform_1(%arg0: i32) -> (i32, i32) {
    %c0_i32 = arith.constant 0 : i32
    %c0_i32_0 = arith.constant 0 : i32
    return %arg0, %c0_i32 : i32, i32
  }
  func.func @transform_2(%arg0: i32) -> (i32, i32) {
    %c0_i32 = arith.constant 0 : i32
    %c0_i32_0 = arith.constant 0 : i32
    %c0_i32_1 = arith.constant 0 : i32
    return %c0_i32, %c0_i32_0 : i32, i32
  }
  func.func @transform_3(%arg0: i32) -> (i32, i32) {
    %c0_i32 = arith.constant 0 : i32
    %c0_i32_0 = arith.constant 0 : i32
    %c0_i32_1 = arith.constant 0 : i32
    return %c0_i32, %c0_i32_0 : i32, i32
  }
  func.func @transform_4(%arg0: i32) -> (i32, i32) {
    %c0_i32 = arith.constant 0 : i32
    %c0_i32_0 = arith.constant 0 : i32
    %c0_i32_1 = arith.constant 0 : i32
    return %c0_i32, %c0_i32_0 : i32, i32
  }
  func.func @transform_5(%arg0: i32) -> (i32, i32) {
    %c0_i32 = arith.constant 0 : i32
    %c0_i32_0 = arith.constant 0 : i32
    %c0_i32_1 = arith.constant 0 : i32
    return %c0_i32, %c0_i32_0 : i32, i32
  }
  func.func @transform_6(%arg0: i32) -> (i32, i32) {
    %c0_i32 = arith.constant 0 : i32
    %c0_i32_0 = arith.constant 0 : i32
    %c0_i32_1 = arith.constant 0 : i32
    return %c0_i32, %c0_i32_0 : i32, i32
  }
  func.func @transform_7(%arg0: i32) -> (i32, i32) {
    %c0_i32 = arith.constant 0 : i32
    %c0_i32_0 = arith.constant 0 : i32
    %c0_i32_1 = arith.constant 0 : i32
    return %c0_i32, %c0_i32_0 : i32, i32
  }
  func.func @transform_8(%arg0: i32) -> (i32, i32) {
    %c0_i32 = arith.constant 0 : i32
    %c0_i32_0 = arith.constant 0 : i32
    %c0_i32_1 = arith.constant 0 : i32
    return %c0_i32, %c0_i32_0 : i32, i32
  }
  func.func @transform_9(%arg0: i32) -> (i32, i32) {
    %c0_i32 = arith.constant 0 : i32
    %c0_i32_0 = arith.constant 0 : i32
    %c0_i32_1 = arith.constant 0 : i32
    return %c0_i32, %c0_i32_0 : i32, i32
  }
  func.func @transform_10(%arg0: i32) -> (i32, i32) {
    %c0_i32 = arith.constant 0 : i32
    %c0_i32_0 = arith.constant 0 : i32
    %c0_i32_1 = arith.constant 0 : i32
    return %c0_i32, %c0_i32_0 : i32, i32
  }
  func.func @transform_11(%arg0: i32) -> (i32, i32) {
    %c0_i32 = arith.constant 0 : i32
    %c0_i32_0 = arith.constant 0 : i32
    %c0_i32_1 = arith.constant 0 : i32
    return %c0_i32, %c0_i32_0 : i32, i32
  }
  func.func @transform_12(%arg0: i32) -> (i32, i32) {
    %c0_i32 = arith.constant 0 : i32
    %c0_i32_0 = arith.constant 0 : i32
    %c0_i32_1 = arith.constant 0 : i32
    return %c0_i32, %c0_i32_0 : i32, i32
  }
  func.func @transform_13(%arg0: i32) -> (i32, i32) {
    %c0_i32 = arith.constant 0 : i32
    %c0_i32_0 = arith.constant 0 : i32
    %c0_i32_1 = arith.constant 0 : i32
    return %c0_i32, %c0_i32_0 : i32, i32
  }
  func.func @transform_14(%arg0: i32) -> (i32, i32) {
    %c0_i32 = arith.constant 0 : i32
    %c0_i32_0 = arith.constant 0 : i32
    return %arg0, %c0_i32 : i32, i32
  }
}

</mosaic_0001>

<bundles_post_ra>
// kernel: tpu_custom_call.1
= control target key start
LH: loop header
LB: loop body
LE: loop exit
PB: predicated region body
PF: predicated region fallthrough
CT: control target
= control target key end

     0   :  { %19 = vsyncpa [#allocation3], 0  ;;  %s999_s0 = inlined_call_operand.vmem [shape: f32[16,32], index: 0, kind: input, shape index: {}]   ;;  %s1000_s1 = inlined_call_operand.vmem [shape: f32[48,32], index: 1, kind: input, shape index: {}]   ;;  %s1001_s2 = inlined_call_operand.vmem [shape: f32[32,32], index: 2, kind: input, shape index: {}]   ;;  %s1002_s3 = inlined_call_operand.vmem [shape: f32[32,32], index: 3, kind: input, shape index: {}]   ;;  %s1003_s4 = inlined_call_operand.hbm [shape: f32[16,32], index: 4, kind: input, shape index: {}]   ;;  %s1004_s5 = inlined_call_operand.vmem [shape: f32[1,32], index: 5, kind: input, shape index: {}]   ;;  %s1005_s6 = inlined_call_operand.vmem [shape: f32[32,32], index: 6, kind: input, shape index: {}]   ;;  %s1006_s7 = inlined_call_operand.vmem [shape: f32[1,32], index: 7, kind: input, shape index: {}]   ;;  %s1007_s8 = inlined_call_operand.vmem [shape: f32[16,3], index: 8, kind: input, shape index: {}]   ;;  %s1008_s9 = inlined_call_operand.hbm [shape: f32[16,16], index: 9, kind: input, shape index: {}]   ;;  %s1009_s10 = inlined_call_operand.vmem [shape: f32[3,16], index: 10, kind: input, shape index: {}]   ;;  %s1010_s11 = inlined_call_operand.vmem [shape: f32[1,16], index: 11, kind: input, shape index: {}]   ;;  %s1011_s12 = inlined_call_operand.vmem [shape: f32[16,3], index: 12, kind: input, shape index: {}]   ;;  %s1012_s13 = inlined_call_operand.vmem [shape: f32[1,3], index: 13, kind: input, shape index: {}]   ;;  %s1013_s14 = inlined_call_operand.vmem [shape: f32[16,3], index: 14, kind: output, shape index: {}]  }
   0x1   :  { %s33_s15 = sshll.u32 %s1003_s4, 4  ;;  %s34_s15 = int_to_ptr.hbm [resolvable:$true] %s33_s15 }
   0x2   :  { %20 = vsyncpa [#allocation5], 0  ;;  %s765_s16 = smov [#allocation2]   ;;  %s54_s20 = sshll.u32 %s1008_s9, 4  ;;  %s55_s20 = int_to_ptr.hbm [resolvable:$true] %s54_s20 }
   0x3   :  { %s35_s17 = sshll.u32 %s765_s16, 4  ;;  %s766_s21 = smov 128   ;;  %s36_s17 = int_to_ptr.vmem [resolvable:$true] %s35_s17 }
   0x4   :  { %s767_s22 = smov 8   ;;  %s768_s23 = smov [#allocation4]  }
   0x5   :  { %41 = dma.hbm_to_vmem [thread:$0]  %s34_s15, 256, %s36_s17, [#allocation3], %s766_s21, %s766_s21, %s767_s22  }
   0x6   :  { %s56_s24 = sshll.u32 %s768_s23, 4  ;;  %s57_s24 = int_to_ptr.vmem [resolvable:$true] %s56_s24 }
   0x7   :  { %62 = dma.hbm_to_vmem [thread:$0]  %s55_s20, 256, %s57_s24, [#allocation5], %s766_s21, %s766_s21, %s767_s22  }
   0x8   :  { %761 = dma.done.wait [#allocation3], 256  }
   0x9   :  { %762 = vsyncadd [#allocation3], 4294967040 }
   0xa   :  { %763 = dma.done.wait [#allocation5], 256  }
   0xb   :  { %764 = vsyncadd [#allocation5], 4294967040  ;;  %v90_v0 = vld [vmem:[%s1001_s2 + $0x18] sm:$0xff]  ;;  %v89_v1 = vld [vmem:[%s1001_s2 + $0x10] sm:$0xff]  ;;  %vm91_vm0 = vcmask 261120   ;;  %vm185_vm2 = vcmask 130048  }
   0xc   :  { %122 = vmatpush.msra.mxu0 %v90_v0  ;;  %v88_v2 = vld [vmem:[%s1001_s2 + $0x8] sm:$0xff]  ;;  %v87_v3 = vld [vmem:[%s1001_s2] sm:$0xff]  ;;  %v83_v6 = vld [vmem:[%s1000_s1 + $0x10] sm:$0xff]  ;;  %s769_s25 = smov 112  }
   0xd   :  { %v81_v4 = vld [vmem:[%s1000_s1] sm:$0xff]  ;;  %v82_v5 = vld [vmem:[%s1000_s1 + $0x8] sm:$0xff]  ;;  %v84_v7 = vld [vmem:[%s1000_s1 + $0x18] sm:$0xff] }
   0xe   :  { %123 = vmatpush.msra.mxu0 %v89_v1  ;;  %v85_v8 = vld [vmem:[%s1000_s1 + $0x20] sm:$0xff]  ;;  %v86_v9 = vld [vmem:[%s1000_s1 + $0x28] sm:$0xff]  ;;  %v182_v16 = vld [vmem:[%s1002_s3 + $0x18] sm:$0xff] }
   0xf   :  { %v184_v12 = vld [vmem:[#allocation2 + $0x8] sm:$0xff]  ;;  %v183_v13 = vld [vmem:[#allocation2] sm:$0xff]  ;;  %v181_v17 = vld [vmem:[%s1002_s3 + $0x10] sm:$0xff] }
  0x10   :  { %124 = vmatpush.msra.mxu0 %v88_v2  ;;  %206 = vmatpush.msra.mxu2 %v184_v12  ;;  %v180_v23 = vld [vmem:[%s1002_s3 + $0x8] sm:$0xff]  ;;  %v179_v24 = vld [vmem:[%s1002_s3] sm:$0xff]  ;;  %v293_v56 = vld [vmem:[%s1005_s6 + $0x18] sm:$0xff] }
  0x11   :  { %v79_v52 = vld [vmem:[%s999_s0] sm:$0xff]  ;;  %v80_v53 = vld [vmem:[%s999_s0 + $0x8] sm:$0xff]  ;;  %v292_v57 = vld [vmem:[%s1005_s6 + $0x10] sm:$0xff]  ;;  %316 = vmatpush.msra.mxu3 %v293_v56 }
  0x12   :  { %125 = vmatpush.msra.mxu0 %v87_v3  ;;  %207 = vmatpush.msra.mxu2 %v183_v13  ;;  %v291_v58 = vld [vmem:[%s1005_s6 + $0x8] sm:$0xff]  ;;  %v290_v59 = vld [vmem:[%s1005_s6] sm:$0xff] }
  0x13   :  { %635 = vmatmul.msk.f32.vlgmr.msra.gmra.mxu0 %vm91_vm0, %v81_v4  ;;  %317 = vmatpush.msra.mxu3 %v292_v57  ;;  %v677_v60 = vld [vmem:[%s1004_s5] ss:$0 sm:$0xff] }
  0x14   :  { %233 = vmatpush.msrb.mxu2 %v182_v16 }
  0x15   :  { %318 = vmatpush.msra.mxu3 %v291_v58 }
  0x16   :  { %234 = vmatpush.msrb.mxu2 %v181_v17 }
  0x17   :  { %319 = vmatpush.msra.mxu3 %v290_v59 }
  0x18   :  { %235 = vmatpush.msrb.mxu2 %v180_v23 }
  0x1a   :  { %236 = vmatpush.msrb.mxu2 %v179_v24 }
  0x1b   :  { %636 = vmatmul.msk.f32.gmra.mxu0 %vm91_vm0, %v82_v5 }
  0x23   :  { %637 = vmatmul.msk.f32.gmra.mxu0 %vm91_vm0, %v83_v6 }
  0x2b   :  { %638 = vmatmul.msk.f32.gmra.mxu0 %vm91_vm0, %v84_v7 }
  0x33   :  { %639 = vmatmul.msk.f32.gmra.mxu0 %vm91_vm0, %v85_v8 }
  0x3b   :  { %640 = vmatmul.msk.f32.gmra.mxu0 %vm91_vm0, %v86_v9 }
  0x90   :  { %v890_v10 = vpop.f32.mrf.mxu0 }
  0x91   :  { %v145_v19 = vmul.f32 %v890_v10, %v890_v10 }
  0x98   :  { %v892_v11 = vpop.f32.mrf.mxu0 }
  0x99   :  { %v146_v27 = vmul.f32 %v892_v11, %v892_v11 }
  0xa0   :  { %v894_v14 = vpop.f32.mrf.mxu0 }
  0xa1   :  { %v147_v18 = vmul.f32 %v894_v14, %v894_v14 }
  0xa3   :  { %v151_v21 = vadd.f32 %v147_v18, %v145_v19 }
  0xa8   :  { %v896_v15 = vpop.f32.mrf.mxu0 }
  0xa9   :  { %v148_v26 = vmul.f32 %v896_v15, %v896_v15 }
  0xab   :  { %v152_v29 = vadd.f32 %v148_v26, %v146_v27 }
  0xb0   :  { %v908_v20 = vpop.f32.mrf.mxu0 }
  0xb1   :  { %v149_v22 = vmul.f32 %v908_v20, %v908_v20 }
  0xb3   :  { %v153_v25 = vadd.f32 %v151_v21, %v149_v22 }
  0xb5   :  { %681 = vrsqrt.f32 %v153_v25  ;;  %vm162_vm1 = vcmp.eq.f32.partialorder %v153_v25, inf  ;;  %v165_v42 = vand.u32 2147483648, %v153_v25  ;;  %vm164_vm3 = vcmp.eq.f32.partialorder %v153_v25, 0.0 }
  0xb8   :  { %v922_v28 = vpop.f32.mrf.mxu0 }
  0xb9   :  { %v150_v30 = vmul.f32 %v922_v28, %v922_v28 }
  0xbb   :  { %v682_v31 = vpop.eup %681  ;;  %v154_v32 = vadd.f32 %v152_v29, %v150_v30 }
  0xbc   :  { %v156_v33 = vmul.f32 %v682_v31, %v153_v25 }
  0xbd   :  { %683 = vrsqrt.f32 %v154_v32  ;;  %vm174_vm4 = vcmp.eq.f32.partialorder %v154_v32, inf  ;;  %v177_v49 = vand.u32 2147483648, %v154_v32  ;;  %vm176_vm5 = vcmp.eq.f32.partialorder %v154_v32, 0.0 }
  0xbe   :  { %v157_v34 = vmul.f32 %v682_v31, %v156_v33 }
  0xc0   :  { %v158_v35 = vmul.f32 0.5, %v157_v34 }
  0xc2   :  { %v159_v36 = vsub.f32 1.5, %v158_v35 }
  0xc3   :  { %v684_v37 = vpop.eup %683 }
  0xc4   :  { %v160_v38 = vmul.f32 %v682_v31, %v159_v36  ;;  %v168_v39 = vmul.f32 %v684_v37, %v154_v32 }
  0xc6   :  { %v161_v40 = vmul.f32 %v160_v38, %v153_v25  ;;  %v169_v41 = vmul.f32 %v684_v37, %v168_v39  ;;  %v474_v38 = vld [vmem:[#allocation4] sm:$0xff]  ;;  %v678_v39 = vld [vmem:[%s1006_s7] ss:$0 sm:$0xff] }
  0xc8   :  { %v163_v43 = vsel %vm162_vm1, %v153_v25, %v161_v40  ;;  %v170_v44 = vmul.f32 0.5, %v169_v41 }
  0xc9   :  { %v166_v45 = vsel %vm164_vm3, %v165_v42, %v163_v43 }
  0xca   :  { %641 = vmatmul.msk.f32.vlgmr.msra.gmra.mxu2 %vm185_vm2, %v166_v45  ;;  %v171_v46 = vsub.f32 1.5, %v170_v44 }
  0xcc   :  { %v172_v47 = vmul.f32 %v684_v37, %v171_v46  ;;  %v475_v37 = vld [vmem:[#allocation4 + $0x8] sm:$0xff] }
  0xcd   :  { %500 = vmatpush.msra.mxu2 %v475_v37 }
  0xce   :  { %v173_v48 = vmul.f32 %v172_v47, %v154_v32 }
  0xcf   :  { %501 = vmatpush.msra.mxu2 %v474_v38 }
  0xd0   :  { %v175_v50 = vsel %vm174_vm4, %v154_v32, %v173_v48 }
  0xd1   :  { %v178_v51 = vsel %vm176_vm5, %v177_v49, %v175_v50 }
  0xd2   :  { %642 = vmatmul.msk.f32.gmra.mxu2 %vm185_vm2, %v178_v51 }
  0xda   :  { %643 = vmatmul.msk.f32.vlgmr.msrb.gmra.mxu2 %vm91_vm0, %v79_v52 }
  0xe2   :  { %644 = vmatmul.msk.f32.gmra.mxu2 %vm91_vm0, %v80_v53 }
 0x14d   :  { %v209_v54 = vpop.f32.mrf.mxu2 }
 0x155   :  { %v212_v55 = vpop.f32.mrf.mxu2 }
 0x15d   :  { %v238_v61 = vpop.f32.mrf.mxu2 }
 0x15e   :  { %v239_v62 = vadd.f32 %v238_v61, %v209_v54 }
 0x160   :  { %v248_v63 = vadd.f32 %v677_v60, %v239_v62 }
 0x162   :  { %v645_v0 = vmul.f32 -1.442695, %v248_v63 }
 0x164   :  { %685 = vpow2.f32 %v645_v0 }
 0x165   :  { %v241_v1 = vpop.f32.mrf.mxu2 }
 0x166   :  { %v242_v2 = vadd.f32 %v241_v1, %v212_v55 }
 0x168   :  { %v249_v3 = vadd.f32 %v677_v60, %v242_v2 }
 0x16a   :  { %v686_v4 = vpop.eup %685  ;;  %v646_v5 = vmul.f32 -1.442695, %v249_v3 }
 0x16b   :  { %v256_v6 = vadd.f32 1.0, %v686_v4 }
 0x16c   :  { %687 = vpow2.f32 %v646_v5 }
 0x16d   :  { %689 = vrcp.f32 %v256_v6  ;;  %v269_v16 = vand.u32 2147483648, %v256_v6  ;;  %v267_v18 = vand.u32 2147483647, %v256_v6  ;;  %vm263_vm7 = vweird.f32 %v256_v6 }
 0x16f   :  { %v270_v22 = vor.u32 1.1754944e-38, %v269_v16  ;;  %vm268_vm9 = vcmp.eq.f32.partialorder %v267_v18, 8.507059e+37 }
 0x172   :  { %v688_v7 = vpop.eup %687 }
 0x173   :  { %v690_v8 = vpop.eup %689  ;;  %v257_v9 = vadd.f32 1.0, %v688_v7 }
 0x174   :  { %v259_v12 = vmul.f32 %v690_v8, %v256_v6  ;;  %vm264_vm6 = vweird.f32 %v690_v8 }
 0x175   :  { %691 = vrcp.f32 %v257_v9  ;;  %vm265_vm8 = vmor %vm263_vm7, %vm264_vm6  ;;  %v284_v29 = vand.u32 2147483648, %v257_v9  ;;  %v282_v31 = vand.u32 2147483647, %v257_v9  ;;  %vm278_vm11 = vweird.f32 %v257_v9 }
 0x176   :  { %v260_v13 = vsub.f32 1.0, %v259_v12 }
 0x177   :  { %v285_v33 = vor.u32 1.1754944e-38, %v284_v29  ;;  %vm283_vm13 = vcmp.eq.f32.partialorder %v282_v31, 8.507059e+37 }
 0x178   :  { %v261_v17 = vmul.f32 %v690_v8, %v260_v13 }
 0x17a   :  { %v262_v19 = vadd.f32 %v690_v8, %v261_v17 }
 0x17b   :  { %v692_v21 = vpop.eup %691 }
 0x17c   :  { %v266_v23 = vsel %vm265_vm8, %v690_v8, %v262_v19  ;;  %v274_v24 = vmul.f32 %v692_v21, %v257_v9  ;;  %vm279_vm10 = vweird.f32 %v692_v21  ;;  %v374_v8 = vld [vmem:[%s1007_s8 + $0x8] sm:$0xff]  ;;  %v373_v9 = vld [vmem:[%s1007_s8] sm:$0xff] }
 0x17d   :  { %v271_v25 = vsel %vm268_vm9, %v270_v22, %v266_v23  ;;  %vm280_vm12 = vmor %vm278_vm11, %vm279_vm10  ;;  %419 = vmatpush.msra.mxu1 %v374_v8  ;;  %v770_v23 = vmov 2  }
 0x17e   :  { %v288_v26 = vmul.f32 %v271_v25, %v248_v63  ;;  %v275_v27 = vsub.f32 1.0, %v274_v24  ;;  %673 = vset.pattern.permute.xlu2 %v770_v23  ;;  %v771_v24 = vmov 1   ;;  %v772_v25 = vmov 0  }
 0x17f   :  { %420 = vmatpush.msra.mxu1 %v373_v9  ;;  %672 = vset.pattern.permute.xlu1 %v771_v24 }
 0x180   :  { %647 = vmatmul.msk.f32.vlgmr.msra.gmra.mxu3 %vm91_vm0, %v288_v26  ;;  %v276_v30 = vmul.f32 %v692_v21, %v275_v27  ;;  %671 = vset.pattern.permute.xlu0 %v772_v25 }
 0x182   :  { %v277_v32 = vadd.f32 %v692_v21, %v276_v30 }
 0x184   :  { %v281_v34 = vsel %vm280_vm12, %v692_v21, %v277_v32 }
 0x185   :  { %v286_v35 = vsel %vm283_vm13, %v285_v33, %v281_v34 }
 0x186   :  { %v289_v36 = vmul.f32 %v286_v35, %v249_v3 }
 0x188   :  { %648 = vmatmul.msk.f32.gmra.mxu3 %vm91_vm0, %v289_v36 }
 0x203   :  { %v321_v40 = vpop.f32.mrf.mxu3 }
 0x204   :  { %v322_v41 = vadd.f32 %v678_v39, %v321_v40 }
 0x206   :  { %v649_v42 = vmul.f32 -1.442695, %v322_v41  ;;  %v371_v43 = vmul.f32 %v322_v41, %v908_v20  ;;  %v369_v44 = vmul.f32 %v322_v41, %v894_v14  ;;  %v367_v45 = vmul.f32 %v322_v41, %v890_v10 }
 0x208   :  { %693 = vpow2.f32 %v649_v42  ;;  %389 = vrot.lane.b32.xlu2 %v371_v43, %s769_s25  ;;  %385 = vrot.lane.b32.xlu1 %v369_v44, %s769_s25 }
 0x209   :  { %381 = vrot.lane.b32.xlu0 %v367_v45, %s769_s25 }
 0x20b   :  { %v324_v46 = vpop.f32.mrf.mxu3 }
 0x20c   :  { %v325_v47 = vadd.f32 %v678_v39, %v324_v46 }
 0x20e   :  { %v694_v48 = vpop.eup %693  ;;  %v650_v49 = vmul.f32 -1.442695, %v325_v47  ;;  %v372_v50 = vmul.f32 %v325_v47, %v922_v28  ;;  %v370_v51 = vmul.f32 %v325_v47, %v896_v15  ;;  %v368_v52 = vmul.f32 %v325_v47, %v892_v11 }
 0x20f   :  { %v333_v20 = vadd.f32 1.0, %v694_v48 }
 0x210   :  { %695 = vpow2.f32 %v650_v49  ;;  %391 = vrot.lane.b32.xlu2 %v372_v50, %s769_s25  ;;  %387 = vrot.lane.b32.xlu1 %v370_v51, %s769_s25 }
 0x211   :  { %697 = vrcp.f32 %v333_v20  ;;  %383 = vrot.lane.b32.xlu0 %v368_v52, %s769_s25  ;;  %v346_v56 = vand.u32 2147483648, %v333_v20  ;;  %v344_v28 = vand.u32 2147483647, %v333_v20  ;;  %vm340_vm15 = vweird.f32 %v333_v20 }
 0x213   :  { %v347_v11 = vor.u32 1.1754944e-38, %v346_v56  ;;  %vm345_vm1 = vcmp.eq.f32.partialorder %v344_v28, 8.507059e+37  ;;  %v592_v28 = vld [vmem:[%s1011_s12 + $0x8] sm:$0xff] }
 0x214   :  { %617 = vmatpush.msrb.mxu3 %v592_v28 }
 0x216   :  { %v696_v10 = vpop.eup %695 }
 0x217   :  { %v698_v14 = vpop.eup %697  ;;  %v334_v53 = vadd.f32 1.0, %v696_v10 }
 0x218   :  { %v336_v54 = vmul.f32 %v698_v14, %v333_v20  ;;  %vm341_vm14 = vweird.f32 %v698_v14 }
 0x219   :  { %699 = vrcp.f32 %v334_v53  ;;  %vm342_vm0 = vmor %vm340_vm15, %vm341_vm14  ;;  %v361_v0 = vand.u32 2147483648, %v334_v53  ;;  %v359_v2 = vand.u32 2147483647, %v334_v53  ;;  %vm355_vm4 = vweird.f32 %v334_v53 }
 0x21a   :  { %v337_v55 = vsub.f32 1.0, %v336_v54 }
 0x21b   :  { %v362_v4 = vor.u32 1.1754944e-38, %v361_v0  ;;  %vm360_vm6 = vcmp.eq.f32.partialorder %v359_v2, 8.507059e+37 }
 0x21c   :  { %v338_v57 = vmul.f32 %v698_v14, %v337_v55 }
 0x21e   :  { %v339_v58 = vadd.f32 %v698_v14, %v338_v57 }
 0x21f   :  { %v700_v15 = vpop.eup %699 }
 0x220   :  { %v343_v59 = vsel %vm342_vm0, %v698_v14, %v339_v58  ;;  %v351_v60 = vmul.f32 %v700_v15, %v334_v53  ;;  %vm356_vm3 = vweird.f32 %v700_v15  ;;  %v591_v58 = vld [vmem:[%s1011_s12] sm:$0xff] }
 0x221   :  { %v348_v61 = vsel %vm345_vm1, %v347_v11, %v343_v59  ;;  %vm357_vm5 = vmor %vm355_vm4, %vm356_vm3  ;;  %618 = vmatpush.msrb.mxu3 %v591_v58  ;;  %v679_v11 = vld [vmem:[%s1010_s11] ss:$0 sm:$0xff]  ;;  %vm626_vm4 = vcmask 23552  }
 0x222   :  { %v365_v62 = vmul.f32 %v348_v61, %v322_v41  ;;  %v352_v63 = vsub.f32 1.0, %v351_v60 }
 0x224   :  { %657 = vmatmul.msk.f32.vlgmr.msra.gmra.mxu2 %vm185_vm2, %v365_v62  ;;  %v353_v1 = vmul.f32 %v700_v15, %v352_v63 }
 0x226   :  { %v354_v3 = vadd.f32 %v700_v15, %v353_v1 }
 0x228   :  { %v358_v5 = vsel %vm357_vm5, %v700_v15, %v354_v3  ;;  %v509_v15 = vld [vmem:[%s1009_s10] sm:$0x7] }
 0x229   :  { %v363_v6 = vsel %vm360_vm6, %v362_v4, %v358_v5  ;;  %v520_v60 = vperm.slane %v509_v15, 0  ;;  %v546_v1 = vperm.slane %v509_v15, 2  ;;  %v533_v2 = vperm.slane %v509_v15, 1 }
 0x22a   :  { %v366_v7 = vmul.f32 %v363_v6, %v325_v47 }
 0x22c   :  { %658 = vmatmul.msk.f32.gmra.mxu2 %vm185_vm2, %v366_v7 }
 0x262   :  { %v390_v18 = vpop.permute.xlu2 %389 }
 0x26a   :  { %v392_v19 = vpop.permute.xlu2 %391 }
 0x27a   :  { %v386_v16 = vpop.permute.xlu1 %385 }
 0x27b   :  { %v382_v12 = vpop.permute.xlu0 %381 }
 0x27c   :  { %651 = vmatmul.msk.f32.vlgmr.msra.gmra.mxu1 %vm185_vm2, %v382_v12 }
 0x282   :  { %v388_v17 = vpop.permute.xlu1 %387 }
 0x283   :  { %v384_v13 = vpop.permute.xlu0 %383 }
 0x284   :  { %652 = vmatmul.msk.f32.gmra.mxu1 %vm185_vm2, %v384_v13 }
 0x28c   :  { %653 = vmatmul.msk.f32.gmra.mxu1 %vm185_vm2, %v386_v16 }
 0x294   :  { %654 = vmatmul.msk.f32.gmra.mxu1 %vm185_vm2, %v388_v17 }
 0x29c   :  { %655 = vmatmul.msk.f32.gmra.mxu1 %vm185_vm2, %v390_v18 }
 0x2a4   :  { %656 = vmatmul.msk.f32.gmra.mxu1 %vm185_vm2, %v392_v19 }
 0x2a7   :  { %v503_v59 = vpop.f32.mrf.mxu2 }
 0x2a8   :  { %v504_v0 = vadd.f32 %v679_v11, %v503_v59 }
 0x2af   :  { %v506_v8 = vpop.f32.mrf.mxu2 }
 0x2b0   :  { %v507_v17 = vadd.f32 %v679_v11, %v506_v8 }
 0x2f9   :  { %v422_v21 = vpop.f32.mrf.mxu1 }
 0x2fa   :  { %v440_v30 = vmul.f32 %v422_v21, %v422_v21 }
 0x301   :  { %v425_v22 = vpop.f32.mrf.mxu1 }
 0x302   :  { %v441_v36 = vmul.f32 %v425_v22, %v425_v22 }
 0x309   :  { %v428_v26 = vpop.f32.mrf.mxu1 }
 0x30a   :  { %v442_v29 = vmul.f32 %v428_v26, %v428_v26 }
 0x30c   :  { %v446_v32 = vadd.f32 %v442_v29, %v440_v30 }
 0x311   :  { %v431_v27 = vpop.f32.mrf.mxu1 }
 0x312   :  { %v443_v35 = vmul.f32 %v431_v27, %v431_v27 }
 0x314   :  { %v447_v38 = vadd.f32 %v443_v35, %v441_v36 }
 0x319   :  { %v434_v31 = vpop.f32.mrf.mxu1 }
 0x31a   :  { %v444_v33 = vmul.f32 %v434_v31, %v434_v31 }
 0x31c   :  { %v448_v34 = vadd.f32 %v446_v32, %v444_v33 }
 0x31e   :  { %701 = vrsqrt.f32 %v448_v34  ;;  %vm457_vm7 = vcmp.eq.f32.partialorder %v448_v34, inf  ;;  %v460_v51 = vand.u32 2147483648, %v448_v34  ;;  %vm459_vm8 = vcmp.eq.f32.partialorder %v448_v34, 0.0 }
 0x321   :  { %v437_v37 = vpop.f32.mrf.mxu1 }
 0x322   :  { %v445_v39 = vmul.f32 %v437_v37, %v437_v37 }
 0x324   :  { %v702_v40 = vpop.eup %701  ;;  %v449_v41 = vadd.f32 %v447_v38, %v445_v39 }
 0x325   :  { %v451_v42 = vmul.f32 %v702_v40, %v448_v34 }
 0x326   :  { %703 = vrsqrt.f32 %v449_v41  ;;  %vm469_vm9 = vcmp.eq.f32.partialorder %v449_v41, inf  ;;  %v472_v55 = vand.u32 2147483648, %v449_v41  ;;  %vm471_vm10 = vcmp.eq.f32.partialorder %v449_v41, 0.0 }
 0x327   :  { %v452_v43 = vmul.f32 %v702_v40, %v451_v42 }
 0x329   :  { %v453_v44 = vmul.f32 0.5, %v452_v43 }
 0x32b   :  { %v454_v45 = vsub.f32 1.5, %v453_v44 }
 0x32c   :  { %v704_v46 = vpop.eup %703 }
 0x32d   :  { %v455_v47 = vmul.f32 %v702_v40, %v454_v45  ;;  %v463_v48 = vmul.f32 %v704_v46, %v449_v41 }
 0x32f   :  { %v456_v49 = vmul.f32 %v455_v47, %v448_v34  ;;  %v464_v50 = vmul.f32 %v704_v46, %v463_v48 }
 0x331   :  { %v458_v52 = vsel %vm457_vm7, %v448_v34, %v456_v49  ;;  %v465_v20 = vmul.f32 0.5, %v464_v50 }
 0x332   :  { %v461_v10 = vsel %vm459_vm8, %v460_v51, %v458_v52 }
 0x333   :  { %539 = vperm.xlu2 %673, %v461_v10   ;;  %526 = vperm.xlu1 %672, %v461_v10   ;;  %v466_v14 = vsub.f32 1.5, %v465_v20 }
 0x334   :  { %512 = vperm.xlu0 %671, %v461_v10   ;;  %v680_v10 = vld [vmem:[%s1012_s13] ss:$0 sm:$0xff] }
 0x335   :  { %v467_v53 = vmul.f32 %v704_v46, %v466_v14 }
 0x337   :  { %v468_v54 = vmul.f32 %v467_v53, %v449_v41 }
 0x339   :  { %v470_v56 = vsel %vm469_vm9, %v449_v41, %v468_v54 }
 0x33a   :  { %v473_v57 = vsel %vm471_vm10, %v472_v55, %v470_v56 }
 0x33b   :  { %675 = vset.pattern.permute.xlu2 %v771_v24  ;;  %674 = vset.pattern.permute.xlu1 %v772_v25 }
 0x33c   :  { %676 = vset.pattern.permute.xlu0 %v770_v23  ;;  %530 = vperm.xlu2 %675, %v473_v57  }
 0x33d   :  { %543 = vperm.xlu0 %676, %v473_v57   ;;  %517 = vperm.xlu1 %674, %v473_v57  }
 0x38d   :  { %v540_v61 = vpop.permute.xlu2 %539 }
 0x38e   :  { %v547_v6 = vmul.f32 %v546_v1, %v540_v61 }
 0x396   :  { %v531_v12 = vpop.permute.xlu2 %530 }
 0x397   :  { %v535_v21 = vmul.f32 %v533_v2, %v531_v12 }
 0x3a5   :  { %v527_v62 = vpop.permute.xlu1 %526 }
 0x3a6   :  { %v513_v63 = vpop.permute.xlu0 %512  ;;  %v534_v4 = vmul.f32 %v533_v2, %v527_v62 }
 0x3a7   :  { %v521_v3 = vmul.f32 %v520_v60, %v513_v63 }
 0x3a9   :  { %v523_v5 = vadd.f32 %v521_v3, %v504_v0 }
 0x3ab   :  { %v536_v7 = vadd.f32 %v534_v4, %v523_v5 }
 0x3ad   :  { %v549_v9 = vadd.f32 %v547_v6, %v536_v7 }
 0x3af   :  { %v659_v13 = vmul.f32 -1.442695, %v549_v9  ;;  %v518_v16 = vpop.permute.xlu1 %517  ;;  %v544_v19 = vpop.permute.xlu0 %543 }
 0x3b0   :  { %v522_v18 = vmul.f32 %v520_v60, %v518_v16  ;;  %v548_v23 = vmul.f32 %v546_v1, %v544_v19 }
 0x3b1   :  { %705 = vpow2.f32 %v659_v13 }
 0x3b2   :  { %v524_v22 = vadd.f32 %v522_v18, %v507_v17 }
 0x3b4   :  { %v537_v24 = vadd.f32 %v535_v21, %v524_v22 }
 0x3b6   :  { %v550_v25 = vadd.f32 %v548_v23, %v537_v24 }
 0x3b7   :  { %v706_v26 = vpop.eup %705 }
 0x3b8   :  { %v557_v27 = vadd.f32 1.0, %v706_v26  ;;  %v660_v29 = vmul.f32 -1.442695, %v550_v25 }
 0x3ba   :  { %707 = vrcp.f32 %v557_v27  ;;  %v570_v35 = vand.u32 2147483648, %v557_v27  ;;  %v568_v37 = vand.u32 2147483647, %v557_v27  ;;  %vm564_vm12 = vweird.f32 %v557_v27 }
 0x3bb   :  { %709 = vpow2.f32 %v660_v29 }
 0x3bc   :  { %v571_v39 = vor.u32 1.1754944e-38, %v570_v35  ;;  %vm569_vm14 = vcmp.eq.f32.partialorder %v568_v37, 8.507059e+37 }
 0x3c0   :  { %v708_v30 = vpop.eup %707 }
 0x3c1   :  { %v710_v31 = vpop.eup %709  ;;  %v560_v32 = vmul.f32 %v708_v30, %v557_v27  ;;  %vm565_vm11 = vweird.f32 %v708_v30 }
 0x3c2   :  { %v558_v33 = vadd.f32 1.0, %v710_v31  ;;  %vm566_vm13 = vmor %vm564_vm12, %vm565_vm11 }
 0x3c3   :  { %v561_v34 = vsub.f32 1.0, %v560_v32 }
 0x3c4   :  { %711 = vrcp.f32 %v558_v33  ;;  %v585_v46 = vand.u32 2147483648, %v558_v33  ;;  %v583_v48 = vand.u32 2147483647, %v558_v33  ;;  %vm579_vm0 = vweird.f32 %v558_v33 }
 0x3c5   :  { %v562_v36 = vmul.f32 %v708_v30, %v561_v34 }
 0x3c6   :  { %v586_v50 = vor.u32 1.1754944e-38, %v585_v46  ;;  %vm584_vm3 = vcmp.eq.f32.partialorder %v583_v48, 8.507059e+37 }
 0x3c7   :  { %v563_v38 = vadd.f32 %v708_v30, %v562_v36 }
 0x3c9   :  { %v567_v40 = vsel %vm566_vm13, %v708_v30, %v563_v38 }
 0x3ca   :  { %v712_v41 = vpop.eup %711  ;;  %v572_v42 = vsel %vm569_vm14, %v571_v39, %v567_v40 }
 0x3cb   :  { %v589_v43 = vmul.f32 %v572_v42, %v549_v9  ;;  %v575_v44 = vmul.f32 %v712_v41, %v558_v33  ;;  %vm580_vm15 = vweird.f32 %v712_v41 }
 0x3cc   :  { %vm581_vm1 = vmor %vm579_vm0, %vm580_vm15 }
 0x3cd   :  { %661 = vmatmul.msk.f32.vlgmr.msrb.gmra.mxu3 %vm185_vm2, %v589_v43  ;;  %v576_v45 = vsub.f32 1.0, %v575_v44 }
 0x3cf   :  { %v577_v47 = vmul.f32 %v712_v41, %v576_v45 }
 0x3d1   :  { %v578_v49 = vadd.f32 %v712_v41, %v577_v47 }
 0x3d3   :  { %v582_v51 = vsel %vm581_vm1, %v712_v41, %v578_v49 }
 0x3d4   :  { %v587_v52 = vsel %vm584_vm3, %v586_v50, %v582_v51 }
 0x3d5   :  { %v590_v20 = vmul.f32 %v587_v52, %v550_v25 }
 0x3d7   :  { %662 = vmatmul.msk.f32.gmra.mxu3 %vm185_vm2, %v590_v20 }
 0x450   :  { %v620_v14 = vpop.f32.mrf.mxu3 }
 0x451   :  { %v621_v53 = vadd.f32 %v680_v10, %v620_v14 }
 0x453   :  { %627 = vst.msk [vmem:[%s1013_s14] sm:$0xff] %vm626_vm4, %v621_v53 }
 0x45a   :  { %v623_v54 = vpop.f32.mrf.mxu3 }
 0x45b   :  { %v624_v55 = vadd.f32 %v680_v10, %v623_v54 }
 0x45d   :  { %628 = vst.msk [vmem:[%s1013_s14 + $0x8] sm:$0xff] %vm626_vm4, %v624_v55 }
 0x45e   :  { %633 = vsyncpa [#allocation3], 1 }
 0x45f   :  { %634 = vsyncpa [#allocation5], 1 }

</bundles_post_ra>
